<compile_context>
chip_gen: v5e
topology: v5e:2x2
jax: 0.10.0
libtpu: 0.0.40
codegen_flags: <defaults>
</compile_context>

<pallas_src>
import functools

import numpy as np
import jax
import jax.numpy as jnp
from jax.experimental import pallas as pl
from jax.experimental.pallas import tpu as pltpu


def _self_attention_kernel(B, S, H, E,
                           x_ref, w1_ref, b1_ref, e_ref, wo_ref, bo_ref,
                           sel_ref, keep_ref, o_ref):
    M = B * H * S
    x = x_ref[...].reshape(M, E)                          # head-major rows, free reshape

    # Fused dense Q/K/V projection over all B*H*S rows (K pre-scaled by 1/sqrt(E)
    # on the host).
    qkv = jnp.dot(x, w1_ref[...], preferred_element_type=jnp.float32) + b1_ref[...]
    qkv = qkv.reshape(B * H, S, 3 * E)                    # leading-dim split: free
    q = qkv[:, :, :E]                                     # (B*H, S, E)
    k = qkv[:, :, E:2 * E]                                # (B*H, S, E), pre-scaled
    v = qkv[:, :, 2 * E:]                                 # (B*H, S, E)

    # Relative embeddings, broadcast over the batch-of-heads dimension.
    if B == 1:
        e_b = e_ref[...]                                  # (H, S, E) == (B*H, S, E)
    else:
        e_b = jnp.broadcast_to(e_ref[...][None], (B, H, S, E)).reshape(B * H, S, E)

    # Head-batched score matmuls (flash-attention style batched dot_general).
    qk = jnp.einsum('bqe,bke->bqk', q, k, preferred_element_type=jnp.float32)
    qe = jnp.einsum('bqe,bke->bqk', q, e_b, preferred_element_type=jnp.float32)

    # PyTorch: qk.masked_fill(triu(ones,1) == 0, -1e20) -> fill where j <= i.
    keep = keep_ref[...] != 0.0                           # (S, S) bool, True where j > i
    logits = jnp.where(keep[None], qk, jnp.float32(-1e20))
    mx = jnp.max(logits, axis=-1, keepdims=True)
    p = jnp.exp(logits - mx)
    denom = jnp.sum(p, axis=-1, keepdims=True)
    attn = p * pl.reciprocal(denom, approx=True)          # EUP slot, ~free

    # _mask_positions + _skew via the host-precomputed one-hot selector
    # (VMEM resident):  s_rel[b, i, j] = qe[b, i, S-1-i+j] if j <= i else 0.
    # Added AFTER the softmax, exactly as in the reference.
    s_rel = jnp.sum(qe[:, :, None, :] * sel_ref[...][None], axis=-1)
    attn = attn + s_rel

    z = jnp.einsum('bqk,bkd->bqd', attn, v, preferred_element_type=jnp.float32)
    z = z.reshape(M, E)                                   # leading-dim merge: free
    out = jnp.dot(z, wo_ref[...], preferred_element_type=jnp.float32) + bo_ref[...]
    o_ref[...] = out.reshape(B, H * S, E)


def _pick_block_batch(N, rows_per_elem, target_rows=256):
    """Largest divisor B of N with ~target_rows matmul rows, keeping >=2 grid steps."""
    cap = N // 2 if N >= 2 else 1          # grid length >= 2 -> both v7x TensorCores busy
    want = max(1, min(cap, pl.cdiv(target_rows, rows_per_elem)))
    for b in range(want, 0, -1):
        if N % b == 0:
            return b
    return 1


def _host_masks(S):
    """Grid-invariant causal keep-mask and fused _mask_positions+_skew selector."""
    i = np.arange(S)
    keep = (i[None, :] > i[:, None]).astype(np.float32)                      # (S, S)
    ii = i[:, None, None]
    jj = i[None, :, None]
    mm = i[None, None, :]
    sel = ((jj <= ii) & (mm == (S - 1) - ii + jj)).astype(np.float32)        # (S, S, S)
    return jnp.asarray(keep), jnp.asarray(sel)


@functools.partial(jax.jit, static_argnames=("seq_len", "heads", "embed_size"))
def self_attention_temporal(x, params, *, seq_len, heads, embed_size):
    N = x.shape[0]
    S, H, E = seq_len, heads, embed_size
    assert x.shape == (N, S * H, E)
    scale = jnp.float32(1.0 / np.sqrt(E))

    # Dense fused QKV weights (no kron inflation); 1/sqrt(E) folded into K.
    w1 = jnp.concatenate(
        [params["wq"].T, params["wk"].T * scale, params["wv"].T], axis=1)    # (E, 3E)
    b1 = jnp.concatenate(
        [params["bq"], params["bk"] * scale, params["bv"]]).reshape(1, 3 * E)
    wo_t = params["wo"].T                                                    # (E, E)
    bo = params["bo"].reshape(1, E)

    keep, sel = _host_masks(S)        # DMA'd once (constant index_map), VMEM resident

    # Head-major layout (row = h*S + s) so every in-kernel reshape is a free
    # leading-dim merge/split and all per-head compute batches into one B*H einsum.
    x_hm = x.reshape(N, S, H, E).transpose(0, 2, 1, 3).reshape(N, H * S, E)

    B = _pick_block_batch(N, H * S)
    kernel = functools.partial(_self_attention_kernel, B, S, H, E)
    out_hm = pl.pallas_call(
        kernel,
        out_shape=jax.ShapeDtypeStruct((N, H * S, E), jnp.float32),
        grid=(N // B,),
        in_specs=[
            pl.BlockSpec((B, H * S, E), lambda n: (n, 0, 0)),   # x (head-major slab)
            pl.BlockSpec((E, 3 * E), lambda n: (0, 0)),         # fused dense QKV weights
            pl.BlockSpec((1, 3 * E), lambda n: (0, 0)),         # fused QKV bias
            pl.BlockSpec((H, S, E), lambda n: (0, 0, 0)),       # relative embeddings
            pl.BlockSpec((E, E), lambda n: (0, 0)),             # fc_out weights
            pl.BlockSpec((1, E), lambda n: (0, 0)),             # fc_out bias
            pl.BlockSpec((S, S, S), lambda n: (0, 0, 0)),       # skew selector
            pl.BlockSpec((S, S), lambda n: (0, 0)),             # causal keep mask
        ],
        out_specs=pl.BlockSpec((B, H * S, E), lambda n: (n, 0, 0)),
        compiler_params=pltpu.CompilerParams(
            dimension_semantics=("parallel",)),
    )(x_hm, w1, b1, params["E"], wo_t, bo, sel, keep)

    # Back to the PyTorch output layout (N, seq_len*heads, embed_size).
    return out_hm.reshape(N, H, S, E).transpose(0, 2, 1, 3).reshape(N, S * H, E)


def reference(x, params, *, seq_len, heads, embed_size):
    """Literal pure-JAX port of the PyTorch forward (temporal, rel_emb=True)."""
    N = x.shape[0]
    S, H, E = seq_len, heads, embed_size
    hp = jax.lax.Precision.HIGHEST

    wq, bq = params["wq"], params["bq"]
    wk, bk = params["wk"], params["bk"]
    wv, bv = params["wv"], params["bv"]
    e_rel = params["E"]
    wo, bo = params["wo"], params["bo"]

    v = jnp.dot(x, wv.T, precision=hp) + bv
    k = jnp.dot(x, wk.T, precision=hp) + bk
    q = jnp.dot(x, wq.T, precision=hp) + bq
    v = v.reshape(N, S, H, E)
    k = k.reshape(N, S, H, E)
    q = q.reshape(N, S, H, E)

    qt = q.transpose(0, 2, 1, 3)                                   # (N, H, S, E)
    qe = jnp.einsum('nhse,hme->nhsm', qt, e_rel, precision=hp)     # (N, H, S, S)
    maskp = jnp.flip(jnp.triu(jnp.ones((S, S), jnp.float32), 1), axis=1)
    qe = jnp.where(maskp == 1, 0.0, qe)
    padded = jnp.pad(qe, ((0, 0), (0, 0), (0, 0), (1, 0)))
    s_rel = padded.reshape(N, H, S + 1, S)[:, :, 1:, :]            # skew

    qk = jnp.einsum('nqhd,nkhd->nhqk', q, k, precision=hp)
    mask = jnp.triu(jnp.ones((S, S), jnp.float32), 1)
    qk = jnp.where(mask == 0, jnp.float32(-1e20), qk)
    attn = jax.nn.softmax(qk / np.sqrt(E), axis=3) + s_rel

    z = jnp.einsum('nhql,nlhd->nqhd', attn, v, precision=hp).reshape(N, S * H, E)
    return jnp.dot(z, wo.T, precision=hp) + bo


if __name__ == "__main__":
    N, H, S, E = 2, 4, 8, 32        # batch, heads, seq_len, embed_size
    key = jax.random.PRNGKey(0)
    ks = jax.random.split(key, 11)
    lin = 1.0 / np.sqrt(E)
    params = {
        "wq": jax.random.uniform(ks[0], (E, E), jnp.float32, -lin, lin),
        "bq": jax.random.uniform(ks[1], (E,), jnp.float32, -lin, lin),
        "wk": jax.random.uniform(ks[2], (E, E), jnp.float32, -lin, lin),
        "bk": jax.random.uniform(ks[3], (E,), jnp.float32, -lin, lin),
        "wv": jax.random.uniform(ks[4], (E, E), jnp.float32, -lin, lin),
        "bv": jax.random.uniform(ks[5], (E,), jnp.float32, -lin, lin),
        "E":  jax.random.normal(ks[6], (H, S, E), jnp.float32),   # rel-emb parameter
        "wo": jax.random.uniform(ks[7], (E, E), jnp.float32, -lin, lin),
        "bo": jax.random.uniform(ks[8], (E,), jnp.float32, -lin, lin),
    }
    x = jax.random.normal(ks[9], (N, S * H, E), jnp.float32)

    out = self_attention_temporal(x, params, seq_len=S, heads=H, embed_size=E)
    out = jax.block_until_ready(out)

    ref = jax.block_until_ready(reference(x, params, seq_len=S, heads=H, embed_size=E))
    assert out.shape == (N, S * H, E)
    np.testing.assert_allclose(np.asarray(out), np.asarray(ref), rtol=5e-3, atol=5e-3)
    print("KERNEL_OK")
</pallas_src>

<mosaic_0001>
module attributes {stable_mosaic.version = 11 : i64} {
  func.func @_self_attention_kernel(%arg0: i32, %arg1: memref<1x32x32xf32, #tpu.memory_space<vmem>>, %arg2: memref<32x96xf32, #tpu.memory_space<vmem>>, %arg3: memref<1x96xf32, #tpu.memory_space<vmem>>, %arg4: memref<4x8x32xf32, #tpu.memory_space<vmem>>, %arg5: memref<32x32xf32, #tpu.memory_space<vmem>>, %arg6: memref<1x32xf32, #tpu.memory_space<vmem>>, %arg7: memref<8x8x8xf32, #tpu.memory_space<vmem>>, %arg8: memref<8x8xf32, #tpu.memory_space<vmem>>, %arg9: memref<1x32x32xf32, #tpu.memory_space<vmem>>) attributes {dimension_semantics = [#tpu.dimension_semantics<parallel>], iteration_bounds = array<i64: 2>, scalar_prefetch = 0 : i64, scratch_operands = 0 : i64, tpu.core_type = #tpu.core_type<tc>, window_params = [{transform_indices = @transform_0, window_bounds = array<i64: 1, 32, 32>}, {pipeline_mode = #tpu.pipeline_mode<synchronous>, transform_indices = @transform_1, window_bounds = array<i64: 32, 96>}, {pipeline_mode = #tpu.pipeline_mode<synchronous>, transform_indices = @transform_2, window_bounds = array<i64: 1, 96>}, {pipeline_mode = #tpu.pipeline_mode<synchronous>, transform_indices = @transform_3, window_bounds = array<i64: 4, 8, 32>}, {pipeline_mode = #tpu.pipeline_mode<synchronous>, transform_indices = @transform_4, window_bounds = array<i64: 32, 32>}, {pipeline_mode = #tpu.pipeline_mode<synchronous>, transform_indices = @transform_5, window_bounds = array<i64: 1, 32>}, {pipeline_mode = #tpu.pipeline_mode<synchronous>, transform_indices = @transform_6, window_bounds = array<i64: 8, 8, 8>}, {pipeline_mode = #tpu.pipeline_mode<synchronous>, transform_indices = @transform_7, window_bounds = array<i64: 8, 8>}, {transform_indices = @transform_8, window_bounds = array<i64: 1, 32, 32>}]} {
    %c0 = arith.constant 0 : index
    %c0_0 = arith.constant 0 : index
    %c0_1 = arith.constant 0 : index
    %0 = vector.load %arg1[%c0, %c0_0, %c0_1] : memref<1x32x32xf32, #tpu.memory_space<vmem>>, vector<1x32x32xf32>
    %1 = vector.shape_cast %0 : vector<1x32x32xf32> to vector<32x32xf32>
    %c0_2 = arith.constant 0 : index
    %c0_3 = arith.constant 0 : index
    %2 = vector.load %arg2[%c0_2, %c0_3] : memref<32x96xf32, #tpu.memory_space<vmem>>, vector<32x96xf32>
    %cst = arith.constant dense<0.000000e+00> : vector<32x96xf32>
    %3 = tpu.matmul %1, %2, %cst {dimension_numbers = #tpu.dot_dimension_numbers<[1], [0], [0], [1], [0, 0, 1, 1], [], []>} : vector<32x32xf32>, vector<32x96xf32>, vector<32x96xf32> -> vector<32x96xf32>
    %c0_4 = arith.constant 0 : index
    %c0_5 = arith.constant 0 : index
    %4 = vector.load %arg3[%c0_4, %c0_5] : memref<1x96xf32, #tpu.memory_space<vmem>>, vector<1x96xf32>
    %5 = vector.broadcast %4 : vector<1x96xf32> to vector<32x96xf32>
    %6 = arith.addf %3, %5 : vector<32x96xf32>
    %7 = vector.shape_cast %6 : vector<32x96xf32> to vector<4x8x96xf32>
    %8 = vector.extract_strided_slice %7 {offsets = [0, 0, 0], sizes = [4, 8, 32], strides = [1, 1, 1]} : vector<4x8x96xf32> to vector<4x8x32xf32>
    %9 = vector.extract_strided_slice %7 {offsets = [0, 0, 32], sizes = [4, 8, 32], strides = [1, 1, 1]} : vector<4x8x96xf32> to vector<4x8x32xf32>
    %10 = vector.extract_strided_slice %7 {offsets = [0, 0, 64], sizes = [4, 8, 32], strides = [1, 1, 1]} : vector<4x8x96xf32> to vector<4x8x32xf32>
    %c0_6 = arith.constant 0 : index
    %c0_7 = arith.constant 0 : index
    %c0_8 = arith.constant 0 : index
    %11 = vector.load %arg4[%c0_6, %c0_7, %c0_8] : memref<4x8x32xf32, #tpu.memory_space<vmem>>, vector<4x8x32xf32>
    "tpu.trace_start"() <{level = 10 : i32, message = "bqe,bke->bqk"}> : () -> ()
    %cst_9 = arith.constant dense<0.000000e+00> : vector<4x8x8xf32>
    %12 = tpu.matmul %8, %9, %cst_9 {dimension_numbers = #tpu.dot_dimension_numbers<[2], [2], [1], [1], [0, 0, 0, 1, 1, 1], [0], [0]>} : vector<4x8x32xf32>, vector<4x8x32xf32>, vector<4x8x8xf32> -> vector<4x8x8xf32>
    %cst_10 = arith.constant dense<0.000000e+00> : vector<4x8x8xf32>
    %13 = tpu.matmul %8, %11, %cst_10 {dimension_numbers = #tpu.dot_dimension_numbers<[2], [2], [1], [1], [0, 0, 0, 1, 1, 1], [0], [0]>} : vector<4x8x32xf32>, vector<4x8x32xf32>, vector<4x8x8xf32> -> vector<4x8x8xf32>
    "tpu.trace_stop"() : () -> ()
    %c0_11 = arith.constant 0 : index
    %c0_12 = arith.constant 0 : index
    %14 = vector.load %arg8[%c0_11, %c0_12] : memref<8x8xf32, #tpu.memory_space<vmem>>, vector<8x8xf32>
    %cst_13 = arith.constant 0.000000e+00 : f32
    %15 = vector.broadcast %cst_13 : f32 to vector<8x8xf32>
    %16 = arith.cmpf one, %14, %15 : vector<8x8xf32>
    %17 = vector.shape_cast %16 : vector<8x8xi1> to vector<1x8x8xi1>
    %cst_14 = arith.constant -1.000000e+20 : f32
    %18 = vector.shape_cast %17 : vector<1x8x8xi1> to vector<1x8x8xi1>
    %19 = vector.broadcast %18 : vector<1x8x8xi1> to vector<4x8x8xi1>
    %20 = vector.broadcast %cst_14 : f32 to vector<4x8x8xf32>
    %21 = arith.select %19, %12, %20 : vector<4x8x8xi1>, vector<4x8x8xf32>
    %cst_15 = arith.constant dense<0xFF800000> : vector<4x8xf32>
    %22 = vector.multi_reduction <maximumf>, %21, %cst_15 [2] : vector<4x8x8xf32> to vector<4x8xf32>
    %23 = vector.shape_cast %22 : vector<4x8xf32> to vector<4x8x1xf32>
    %24 = vector.broadcast %23 : vector<4x8x1xf32> to vector<4x8x8xf32>
    %25 = arith.subf %21, %24 : vector<4x8x8xf32>
    %26 = math.exp %25 : vector<4x8x8xf32>
    %cst_16 = arith.constant dense<0.000000e+00> : vector<4x8xf32>
    %27 = vector.multi_reduction <add>, %26, %cst_16 [2] : vector<4x8x8xf32> to vector<4x8xf32>
    %28 = vector.shape_cast %27 : vector<4x8xf32> to vector<4x8x1xf32>
    %29 = tpu.reciprocal %28 {approx = true} : vector<4x8x1xf32> -> vector<4x8x1xf32>
    %30 = vector.broadcast %29 : vector<4x8x1xf32> to vector<4x8x8xf32>
    %31 = arith.mulf %26, %30 : vector<4x8x8xf32>
    %32 = vector.shape_cast %13 : vector<4x8x8xf32> to vector<4x8x1x8xf32>
    %c0_17 = arith.constant 0 : index
    %c0_18 = arith.constant 0 : index
    %c0_19 = arith.constant 0 : index
    %33 = vector.load %arg7[%c0_17, %c0_18, %c0_19] : memref<8x8x8xf32, #tpu.memory_space<vmem>>, vector<8x8x8xf32>
    %34 = vector.shape_cast %33 : vector<8x8x8xf32> to vector<1x8x8x8xf32>
    %35 = vector.broadcast %32 : vector<4x8x1x8xf32> to vector<4x8x8x8xf32>
    %36 = vector.broadcast %34 : vector<1x8x8x8xf32> to vector<4x8x8x8xf32>
    %37 = arith.mulf %35, %36 : vector<4x8x8x8xf32>
    %cst_20 = arith.constant dense<0.000000e+00> : vector<4x8x8xf32>
    %38 = vector.multi_reduction <add>, %37, %cst_20 [3] : vector<4x8x8x8xf32> to vector<4x8x8xf32>
    %39 = arith.addf %31, %38 : vector<4x8x8xf32>
    "tpu.trace_start"() <{level = 10 : i32, message = "bqk,bkd->bqd"}> : () -> ()
    %cst_21 = arith.constant dense<0.000000e+00> : vector<4x8x32xf32>
    %40 = tpu.matmul %39, %10, %cst_21 {dimension_numbers = #tpu.dot_dimension_numbers<[2], [1], [1], [2], [0, 0, 0, 1, 1, 2], [0], [0]>} : vector<4x8x8xf32>, vector<4x8x32xf32>, vector<4x8x32xf32> -> vector<4x8x32xf32>
    "tpu.trace_stop"() : () -> ()
    %41 = vector.shape_cast %40 : vector<4x8x32xf32> to vector<32x32xf32>
    %c0_22 = arith.constant 0 : index
    %c0_23 = arith.constant 0 : index
    %42 = vector.load %arg5[%c0_22, %c0_23] : memref<32x32xf32, #tpu.memory_space<vmem>>, vector<32x32xf32>
    %cst_24 = arith.constant dense<0.000000e+00> : vector<32x32xf32>
    %43 = tpu.matmul %41, %42, %cst_24 {dimension_numbers = #tpu.dot_dimension_numbers<[1], [0], [0], [1], [0, 0, 1, 1], [], []>} : vector<32x32xf32>, vector<32x32xf32>, vector<32x32xf32> -> vector<32x32xf32>
    %c0_25 = arith.constant 0 : index
    %c0_26 = arith.constant 0 : index
    %44 = vector.load %arg6[%c0_25, %c0_26] : memref<1x32xf32, #tpu.memory_space<vmem>>, vector<1x32xf32>
    %45 = vector.broadcast %44 : vector<1x32xf32> to vector<32x32xf32>
    %46 = arith.addf %43, %45 : vector<32x32xf32>
    %47 = vector.shape_cast %46 : vector<32x32xf32> to vector<1x32x32xf32>
    %c0_27 = arith.constant 0 : index
    %c0_28 = arith.constant 0 : index
    %c0_29 = arith.constant 0 : index
    %48 = vector.load %arg9[%c0_27, %c0_28, %c0_29] : memref<1x32x32xf32, #tpu.memory_space<vmem>>, vector<1x32x32xf32>
    tpu.vector_store %arg9[%c0_27, %c0_28, %c0_29], %47 {strides = array<i32>} : memref<1x32x32xf32, #tpu.memory_space<vmem>>, vector<1x32x32xf32>,
    return
  }
  func.func @transform_0(%arg0: i32) -> (i32, i32, i32) {
    %c0_i32 = arith.constant 0 : i32
    %c0_i32_0 = arith.constant 0 : i32
    %c0_i32_1 = arith.constant 0 : i32
    return %arg0, %c0_i32, %c0_i32_0 : i32, i32, i32
  }
  func.func @transform_1(%arg0: i32) -> (i32, i32) {
    %c0_i32 = arith.constant 0 : i32
    %c0_i32_0 = arith.constant 0 : i32
    %c0_i32_1 = arith.constant 0 : i32
    return %c0_i32, %c0_i32_0 : i32, i32
  }
  func.func @transform_2(%arg0: i32) -> (i32, i32) {
    %c0_i32 = arith.constant 0 : i32
    %c0_i32_0 = arith.constant 0 : i32
    %c0_i32_1 = arith.constant 0 : i32
    return %c0_i32, %c0_i32_0 : i32, i32
  }
  func.func @transform_3(%arg0: i32) -> (i32, i32, i32) {
    %c0_i32 = arith.constant 0 : i32
    %c0_i32_0 = arith.constant 0 : i32
    %c0_i32_1 = arith.constant 0 : i32
    %c0_i32_2 = arith.constant 0 : i32
    return %c0_i32, %c0_i32_0, %c0_i32_1 : i32, i32, i32
  }
  func.func @transform_4(%arg0: i32) -> (i32, i32) {
    %c0_i32 = arith.constant 0 : i32
    %c0_i32_0 = arith.constant 0 : i32
    %c0_i32_1 = arith.constant 0 : i32
    return %c0_i32, %c0_i32_0 : i32, i32
  }
  func.func @transform_5(%arg0: i32) -> (i32, i32) {
    %c0_i32 = arith.constant 0 : i32
    %c0_i32_0 = arith.constant 0 : i32
    %c0_i32_1 = arith.constant 0 : i32
    return %c0_i32, %c0_i32_0 : i32, i32
  }
  func.func @transform_6(%arg0: i32) -> (i32, i32, i32) {
    %c0_i32 = arith.constant 0 : i32
    %c0_i32_0 = arith.constant 0 : i32
    %c0_i32_1 = arith.constant 0 : i32
    %c0_i32_2 = arith.constant 0 : i32
    return %c0_i32, %c0_i32_0, %c0_i32_1 : i32, i32, i32
  }
  func.func @transform_7(%arg0: i32) -> (i32, i32) {
    %c0_i32 = arith.constant 0 : i32
    %c0_i32_0 = arith.constant 0 : i32
    %c0_i32_1 = arith.constant 0 : i32
    return %c0_i32, %c0_i32_0 : i32, i32
  }
  func.func @transform_8(%arg0: i32) -> (i32, i32, i32) {
    %c0_i32 = arith.constant 0 : i32
    %c0_i32_0 = arith.constant 0 : i32
    %c0_i32_1 = arith.constant 0 : i32
    return %arg0, %c0_i32, %c0_i32_0 : i32, i32, i32
  }
}

</mosaic_0001>

<bundles_post_ra>
// kernel: self_attention_temporal.1
= control target key start
LH: loop header
LB: loop body
LE: loop exit
PB: predicated region body
PF: predicated region fallthrough
CT: control target
= control target key end

     0   :  { %s1303_s27 = smov 0   ;;  %s1666_s0 = inlined_call_operand.vmem [shape: f32[2,32,32], index: 0, kind: input, shape index: {}]   ;;  %s1667_s1 = inlined_call_operand.vmem [shape: f32[32,96], index: 1, kind: input, shape index: {}]   ;;  %s1668_s2 = inlined_call_operand.vmem [shape: f32[1,96], index: 2, kind: input, shape index: {}]   ;;  %s1669_s3 = inlined_call_operand.vmem [shape: f32[4,8,32], index: 3, kind: input, shape index: {}]   ;;  %s1670_s4 = inlined_call_operand.vmem [shape: f32[32,32], index: 4, kind: input, shape index: {}]   ;;  %s1671_s5 = inlined_call_operand.vmem [shape: f32[1,32], index: 5, kind: input, shape index: {}]   ;;  %s1672_s6 = inlined_call_operand.vmem [shape: f32[8,8,8], index: 6, kind: input, shape index: {}]   ;;  %s1673_s7 = inlined_call_operand.vmem [shape: f32[8,8], index: 7, kind: input, shape index: {}]   ;;  %s1674_s8 = inlined_call_operand.vmem [shape: f32[2,32,32], index: 8, kind: output, shape index: {}]  }
   0x1 LB: > { %s1170_s28 = sadd.s32 4294967295, %s1254_s27   ;;  %p1174_p0 = scmp.ge.s32.totalorder %s1254_s27, 1  ;;  %s1254_s27 = sphi %s1303_s27, %s18_s27  }
   0x2   : > { %p262_p1 = scmp.lt.s32.totalorder %s1254_s27, 3 }
   0x4   : > { %p263_p2 = pnand %p1174_p0, %p262_p1 }
   0x5   : > { %p296_p3 = scmp.lt.s32.totalorder (!%p263_p2), %s1170_s28, 1  ;;  %s1256_s25 = smov (!%p263_p2), 96  }
   0x6   : > { %266 = sbr.rel (%p263_p2) target bundleno = 996 (0x3e4), region = 52  ;;  %s1257_s9 = smov (!%p263_p2), 64  }
   0xb   : > { %v313_v0 = vld [vmem:[%s1667_s1 + $0x18] sm:$0xff]  ;;  %v312_v1 = vld [vmem:[%s1667_s1 + $0x10] sm:$0xff]  ;;  %v311_v2 = vld [vmem:[%s1667_s1 + $0x8] sm:$0xff]  ;;  %s1676_s28 = smov (!%p296_p3, %s1170_s28), 1  ;;  %vm318_vm0 = vcmask 261120   ;;  %vm572_vm1 = vcmask 64512  }
   0xc   : > { %343 = vmatpush.msra.mxu0 %v313_v0  ;;  %v310_v3 = vld [vmem:[%s1667_s1] sm:$0xff]  ;;  %s1209_s15 = sshll.u32 %s1676_s28, 5  ;;  %v363_v9 = vld [vmem:[%s1669_s3 + $0x18] sm:$0xff]  ;;  %v361_v20 = vld [vmem:[%s1669_s3 + $0x8] sm:$0xff]  ;;  %vm915_vm3 = vcmask 1041409   ;;  %vm917_vm4 = vcmask 1042434  }
   0xd   : > { %s300_s18 = scalar_lea.vmem %s1666_s0, %s1209_s15  ;;  %v360_v8 = vld [vmem:[%s1669_s3] sm:$0xff]  ;;  %v1383_v29 = vld [vmem:[%s1672_s6 + $0x10] sm:$0xff]  ;;  %v1394_v39 = vld [vmem:[%s1672_s6 + $0x8] sm:$0xff]  ;;  %vm919_vm5 = vcmask 1043459   ;;  %vm921_vm6 = vcmask 1044484   ;;  %vm923_vm7 = vcmask 1045509   ;;  %s305_s23 = scalar_lea.vmem %s1674_s8, %s1209_s15 }
   0xe   : > { %344 = vmatpush.msra.mxu0 %v312_v1  ;;  %v306_v4 = vld [vmem:[%s300_s18] sm:$0xff]  ;;  %v307_v5 = vld [vmem:[%s300_s18 + $0x8] sm:$0xff]  ;;  %v308_v6 = vld [vmem:[%s300_s18 + $0x10] sm:$0xff]  ;;  %1191 = vmatpush.xpose.msk.msra.mxu2 %vm318_vm0, %v360_v8  ;;  %vm925_vm8 = vcmask 1046534   ;;  %vm927_vm9 = vcmask 1047559  }
   0xf   : > { %v309_v7 = vld [vmem:[%s300_s18 + $0x18] sm:$0xff]  ;;  %v1230_v10 = vld [vmem:[%s1668_s2] ss:$0 sm:$0xff]  ;;  %v362_v40 = vld [vmem:[%s1669_s3 + $0x10] sm:$0xff] }
  0x10   : > { %345 = vmatpush.msra.mxu0 %v311_v2  ;;  %v1372_v23 = vld [vmem:[%s1672_s6] sm:$0xff]  ;;  %v1405_v45 = vld [vmem:[%s1672_s6 + $0x38] sm:$0xff]  ;;  %v1412_v48 = vld [vmem:[%s1672_s6 + $0x28] sm:$0xff] }
  0x11   : > { %v1378_v28 = vld [vmem:[%s1672_s6 + $0x20] sm:$0xff]  ;;  %v1424_v54 = vld [vmem:[%s1672_s6 + $0x18] sm:$0xff]  ;;  %v1438_v62 = vld [vmem:[%s1672_s6 + $0x30] sm:$0xff] }
  0x12   : > { %346 = vmatpush.msra.mxu0 %v310_v3  ;;  %1197 = vmatpush.xpose.msk.msrb.mxu2 %vm318_vm0, %v363_v9 }
  0x13   : > { %1179 = vmatmul.msk.f32.vlgmr.msra.gmra.mxu0 %vm318_vm0, %v306_v4 }
  0x1b   : > { %1180 = vmatmul.msk.f32.gmra.mxu0 %vm318_vm0, %v307_v5 }
  0x23   : > { %1181 = vmatmul.msk.f32.gmra.mxu0 %vm318_vm0, %v308_v6 }
  0x2b   : > { %1182 = vmatmul.msk.f32.gmra.mxu0 %vm318_vm0, %v309_v7 }
  0x90   : > { %v348_v11 = vpop.f32.mrf.mxu0 }
  0x91   : > { %v1346_v12 = vadd.f32 %v1230_v10, %v348_v11 }
  0x93   : > { %365 = vrot.lane.b32.xlu0 %v1346_v12, %s1256_s25  ;;  %1192 = vmatmul.msk.f32.vlgmr.msra.gmra.mxu2 %vm318_vm0, %v1346_v12 }
  0x98   : > { %v351_v13 = vpop.f32.mrf.mxu0 }
  0x99   : > { %v1359_v18 = vadd.f32 %v1230_v10, %v351_v13 }
  0xa0   : > { %v354_v14 = vpop.f32.mrf.mxu0 }
  0xa1   : > { %v1351_v15 = vadd.f32 %v1230_v10, %v354_v14 }
  0xa3   : > { %419 = vrot.lane.b32.xlu0 %v1351_v15, %s1256_s25 }
  0xa8   : > { %v357_v16 = vpop.f32.mrf.mxu0 }
  0xa9   : > { %v1354_v17 = vadd.f32 %v1230_v10, %v357_v16 }
  0xab   : > { %446 = vrot.lane.b32.xlu1 %v1354_v17, %s1256_s25  ;;  %1198 = vmatmul.msk.f32.vlgmr.msrb.gmra.mxu2 %vm318_vm0, %v1354_v17 }
  0xb3   : > { %392 = vrot.lane.b32.xlu1 %v1359_v18, %s1256_s25 }
 0x105   : > { %v366_v19 = vpop.permute.xlu0 %365 }
 0x106   : > { %1183 = vmatpush.xpose.msk.msra.mxu3 %vm318_vm0, %v366_v19 }
 0x109   : > { %1184 = vmatmul.msk.f32.vlgmr.msra.gmra.mxu3 %vm318_vm0, %v1346_v12 }
 0x115   : > { %v420_v21 = vpop.permute.xlu0 %419 }
 0x116   : > { %1187 = vmatpush.xpose.msk.msrb.mxu3 %vm318_vm0, %v420_v21  ;;  %v492_v22 = vpop.f32.mrf.mxu2 }
 0x117   : > { %v657_v24 = vperm.slane %v492_v22, 0  ;;  %v624_v25 = vrot.slane %v492_v22, 4  ;;  %v622_v26 = vrot.slane %v492_v22, 2  ;;  %v621_v27 = vrot.slane %v492_v22, 1 }
 0x118   : > { %v627_v33 = vrot.slane %v492_v22, 7  ;;  %v625_v34 = vrot.slane %v492_v22, 5  ;;  %v623_v49 = vrot.slane %v492_v22, 3  ;;  %v626_v58 = vrot.slane %v492_v22, 6 }
 0x119   : > { %1188 = vmatmul.msk.f32.vlgmr.msrb.gmra.mxu3 %vm318_vm0, %v1351_v15  ;;  %v721_v30 = vmul.f32 %v657_v24, %v1372_v23  ;;  %v661_v31 = vperm.slane %v624_v25, 0  ;;  %v659_v32 = vperm.slane %v622_v26, 0  ;;  %v658_v38 = vperm.slane %v621_v27, 0  ;;  %v564_v26 = vld [vmem:[%s1673_s7] sm:$0xff] }
 0x11a   : > { %1193 = vmatpush.xpose.msk.msra.mxu3 %vm318_vm0, %v361_v20  ;;  %v664_v44 = vperm.slane %v627_v33, 0  ;;  %v662_v46 = vperm.slane %v625_v34, 0  ;;  %v660_v53 = vperm.slane %v623_v49, 0  ;;  %v663_v60 = vperm.slane %v626_v58, 0 }
 0x11b   : > { %v753_v35 = vsel %vm572_vm1, %v721_v30, 0.0  ;;  %v725_v36 = vmul.f32 %v661_v31, %v1378_v28  ;;  %v723_v37 = vmul.f32 %v659_v32, %v1383_v29  ;;  %v722_v47 = vmul.f32 %v658_v38, %v1394_v39 }
 0x11c   : > { %754 = vadd.xlane.f32.xlu2 %v753_v35  ;;  %v728_v50 = vmul.f32 %v664_v44, %v1405_v45  ;;  %v726_v51 = vmul.f32 %v662_v46, %v1412_v48  ;;  %v724_v59 = vmul.f32 %v660_v53, %v1424_v54  ;;  %v727_v0 = vmul.f32 %v663_v60, %v1438_v62 }
 0x11d   : > { %v447_v41 = vpop.permute.xlu1 %446  ;;  %v765_v42 = vsel %vm572_vm1, %v725_v36, 0.0  ;;  %v759_v43 = vsel %vm572_vm1, %v723_v37, 0.0  ;;  %v756_v52 = vsel %vm572_vm1, %v722_v47, 0.0  ;;  %vm565_vm2 = vcmp.ne.f32.partialorder %v564_v26, 0.0 }
 0x11e   : > { %1189 = vmatpush.xpose.msk.msra.mxu1 %vm318_vm0, %v447_v41  ;;  %766 = vadd.xlane.f32.xlu1 %v765_v42  ;;  %v774_v56 = vsel %vm572_vm1, %v728_v50, 0.0  ;;  %v768_v57 = vsel %vm572_vm1, %v726_v51, 0.0  ;;  %v762_v61 = vsel %vm572_vm1, %v724_v59, 0.0  ;;  %v771_v9 = vsel %vm572_vm1, %v727_v0, 0.0 }
 0x11f   : > { %760 = vadd.xlane.f32.xlu0 %v759_v43  ;;  %v881_v33 = vlaneseq }
 0x121   : > { %1190 = vmatmul.msk.f32.vlgmr.msra.gmra.mxu1 %vm318_vm0, %v1354_v17  ;;  %1194 = vmatmul.msk.f32.vlgmr.msra.gmra.mxu3 %vm318_vm0, %v1359_v18  ;;  %v1467_v34 = vand.u32 127, %v881_v33 }
 0x122   : > { %1195 = vmatpush.xpose.msk.msrb.mxu1 %vm318_vm0, %v362_v40 }
 0x124   : > { %757 = vadd.xlane.f32.xlu2 %v756_v52 }
 0x125   : > { %v393_v55 = vpop.permute.xlu1 %392 }
 0x126   : > { %1185 = vmatpush.xpose.msk.msrb.mxu0 %vm318_vm0, %v393_v55  ;;  %775 = vadd.xlane.f32.xlu1 %v774_v56 }
 0x127   : > { %769 = vadd.xlane.f32.xlu0 %v768_v57 }
 0x129   : > { %1186 = vmatmul.msk.f32.vlgmr.msrb.gmra.mxu0 %vm318_vm0, %v1359_v18  ;;  %1196 = vmatmul.msk.f32.vlgmr.msrb.gmra.mxu1 %vm318_vm0, %v1351_v15 }
 0x12c   : > { %763 = vadd.xlane.f32.xlu2 %v762_v61 }
 0x12e   : > { %v1440_v63 = vpop.f32.mrf.mxu2 }
 0x12f   : > { %v681_v1 = vperm.slane %v1440_v63, 0  ;;  %v643_v2 = vrot.slane %v1440_v63, 2  ;;  %v644_v3 = vrot.slane %v1440_v63, 3  ;;  %v642_v4 = vrot.slane %v1440_v63, 1 }
 0x130   : > { %v645_v19 = vrot.slane %v1440_v63, 4 }
 0x131   : > { %v745_v5 = vmul.f32 %v681_v1, %v1372_v23  ;;  %v683_v6 = vperm.slane %v643_v2, 0  ;;  %v684_v7 = vperm.slane %v644_v3, 0  ;;  %v682_v8 = vperm.slane %v642_v4, 0 }
 0x132   : > { %v685_v22 = vperm.slane %v645_v19, 0 }
 0x133   : > { %v825_v10 = vsel %vm572_vm1, %v745_v5, 0.0  ;;  %v747_v11 = vmul.f32 %v683_v6, %v1383_v29  ;;  %v748_v14 = vmul.f32 %v684_v7, %v1424_v54  ;;  %v746_v16 = vmul.f32 %v682_v8, %v1394_v39 }
 0x134   : > { %772 = vadd.xlane.f32.xlu2 %v771_v9  ;;  %826 = vadd.xlane.f32.xlu1 %v825_v10  ;;  %v749_v24 = vmul.f32 %v685_v22, %v1378_v28 }
 0x135   : > { %v831_v13 = vsel %vm572_vm1, %v747_v11, 0.0  ;;  %v834_v20 = vsel %vm572_vm1, %v748_v14, 0.0  ;;  %v828_v21 = vsel %vm572_vm1, %v746_v16, 0.0 }
 0x136   : > { %832 = vadd.xlane.f32.xlu0 %v831_v13  ;;  %v837_v25 = vsel %vm572_vm1, %v749_v24, 0.0 }
 0x13c   : > { %835 = vadd.xlane.f32.xlu1 %v834_v20  ;;  %829 = vadd.xlane.f32.xlu2 %v828_v21 }
 0x144   : > { %838 = vadd.xlane.f32.xlu2 %v837_v25 }
 0x18c   : > { %v388_v27 = vpop.f32.mrf.mxu3 }
 0x18d   : > { %v1463_v30 = vsel %vm565_vm2, %v388_v27, -1e+20 }
 0x18e   : > { %v573_v31 = vsel %vm572_vm1, %v1463_v30, -inf }
 0x18f   : > { %v755_v32 = vpop.xlane.xlu2 %754  ;;  %574 = vmax.xlane.f32.xlu2 %v573_v31 }
 0x190   : > { %v883_v37 = vperm.slane %v755_v32, %v1467_v34 }
 0x191   : > { %v767_v42 = vpop.xlane.xlu1 %766 }
 0x192   : > { %v761_v35 = vpop.xlane.xlu0 %760  ;;  %v887_v56 = vperm.slane %v767_v42, %v1467_v34 }
 0x193   : > { %v885_v40 = vperm.slane %v761_v35, %v1467_v34 }
 0x197   : > { %v758_v36 = vpop.xlane.xlu2 %757 }
 0x198   : > { %v884_v38 = vperm.slane %v758_v36, %v1467_v34 }
 0x199   : > { %v776_v61 = vpop.xlane.xlu1 %775 }
 0x19a   : > { %v916_v41 = vsel %vm915_vm3, %v884_v38, %v883_v37  ;;  %v770_v50 = vpop.xlane.xlu0 %769  ;;  %v890_v7 = vperm.slane %v776_v61, %v1467_v34  ;;  %v648_v61 = vrot.slane %v1440_v63, 7 }
 0x19b   : > { %v918_v43 = vsel %vm917_vm4, %v885_v40, %v916_v41  ;;  %v888_v57 = vperm.slane %v770_v50, %v1467_v34  ;;  %v646_v50 = vrot.slane %v1440_v63, 5 }
 0x19c   : > { %v442_v44 = vpop.f32.mrf.mxu3 }
 0x19d   : > { %v1475_v46 = vsel %vm565_vm2, %v442_v44, -1e+20 }
 0x19e   : > { %v469_v47 = vpop.f32.mrf.mxu1  ;;  %v579_v49 = vsel %vm572_vm1, %v1475_v46, -inf }
 0x19f   : > { %v1480_v51 = vsel %vm565_vm2, %v469_v47, -1e+20  ;;  %v764_v52 = vpop.xlane.xlu2 %763  ;;  %580 = vmax.xlane.f32.xlu2 %v579_v49 }
 0x1a0   : > { %v886_v53 = vperm.slane %v764_v52, %v1467_v34  ;;  %v582_v55 = vsel %vm572_vm1, %v1480_v51, -inf }
 0x1a1   : > { %583 = vmax.xlane.f32.xlu0 %v582_v55 }
 0x1a2   : > { %v920_v58 = vsel %vm919_vm5, %v886_v53, %v918_v43 }
 0x1a3   : > { %v922_v59 = vsel %vm921_vm6, %v887_v56, %v920_v58 }
 0x1a4   : > { %v924_v60 = vsel %vm923_vm7, %v888_v57, %v922_v59  ;;  %v686_v57 = vperm.slane %v646_v50, 0 }
 0x1a6   : > { %v415_v0 = vpop.f32.mrf.mxu0  ;;  %v538_v1 = vpop.f32.mrf.mxu1 }
 0x1a7   : > { %v1491_v2 = vsel %vm565_vm2, %v415_v0, -1e+20  ;;  %v773_v3 = vpop.xlane.xlu2 %772  ;;  %v673_v4 = vperm.slane %v538_v1, 0  ;;  %v637_v5 = vrot.slane %v538_v1, 3  ;;  %v636_v6 = vrot.slane %v538_v1, 2  ;;  %v827_v32 = vpop.xlane.xlu1 %826 }
 0x1a8   : > { %v889_v8 = vperm.slane %v773_v3, %v1467_v34  ;;  %v576_v9 = vsel %vm572_vm1, %v1491_v2, -inf  ;;  %v635_v10 = vrot.slane %v538_v1, 1  ;;  %v640_v16 = vrot.slane %v538_v1, 6 }
 0x1a9   : > { %577 = vmax.xlane.f32.xlu1 %v576_v9  ;;  %v737_v11 = vmul.f32 %v673_v4, %v1372_v23  ;;  %v676_v13 = vperm.slane %v637_v5, 0  ;;  %v675_v14 = vperm.slane %v636_v6, 0  ;;  %v639_v26 = vrot.slane %v538_v1, 5 }
 0x1aa   : > { %v926_v19 = vsel %vm925_vm8, %v889_v8, %v924_v60  ;;  %v674_v24 = vperm.slane %v635_v10, 0  ;;  %v679_v31 = vperm.slane %v640_v16, 0  ;;  %v638_v36 = vrot.slane %v538_v1, 4 }
 0x1ab   : > { %v1500_v20 = vsel %vm927_vm9, %v890_v7, %v926_v19  ;;  %v801_v21 = vsel %vm572_vm1, %v737_v11, 0.0  ;;  %v740_v22 = vmul.f32 %v676_v13, %v1424_v54  ;;  %v739_v25 = vmul.f32 %v675_v14, %v1383_v29  ;;  %v1531_v11 = vpop.xlane.xlu0 %832 }
 0x1ac   : > { %802 = vadd.xlane.f32.xlu2 %v801_v21  ;;  %v738_v35 = vmul.f32 %v674_v24, %v1394_v39  ;;  %v907_v37 = vperm.slane %v827_v32, %v1467_v34  ;;  %v678_v41 = vperm.slane %v639_v26, 0  ;;  %v743_v42 = vmul.f32 %v679_v31, %v1438_v62 }
 0x1ad   : > { %v810_v27 = vsel %vm572_vm1, %v740_v22, 0.0  ;;  %v807_v40 = vsel %vm572_vm1, %v739_v25, 0.0  ;;  %v677_v47 = vperm.slane %v638_v36, 0  ;;  %v641_v55 = vrot.slane %v538_v1, 7 }
 0x1ae   : > { %811 = vadd.xlane.f32.xlu0 %v810_v27  ;;  %v804_v44 = vsel %vm572_vm1, %v738_v35, 0.0  ;;  %v742_v49 = vmul.f32 %v678_v41, %v1412_v48  ;;  %v819_v52 = vsel %vm572_vm1, %v743_v42, 0.0  ;;  %v750_v60 = vmul.f32 %v686_v57, %v1412_v48 }
 0x1af   : > { %v830_v33 = vpop.xlane.xlu2 %829  ;;  %v741_v53 = vmul.f32 %v677_v47, %v1378_v28  ;;  %v680_v59 = vperm.slane %v641_v55, 0  ;;  %v688_v4 = vperm.slane %v648_v61, 0  ;;  %v1538_v21 = vpop.xlane.xlu1 %835  ;;  %v647_v26 = vrot.slane %v1440_v63, 6 }
 0x1b0   : > { %v908_v38 = vperm.slane %v830_v33, %v1467_v34  ;;  %v816_v56 = vsel %vm572_vm1, %v742_v49, 0.0  ;;  %v840_v3 = vsel %vm572_vm1, %v750_v60, 0.0 }
 0x1b1   : > { %808 = vadd.xlane.f32.xlu1 %v807_v40  ;;  %v813_v58 = vsel %vm572_vm1, %v741_v53, 0.0  ;;  %v744_v0 = vmul.f32 %v680_v59, %v1405_v45  ;;  %v752_v5 = vmul.f32 %v688_v4, %v1405_v45 }
 0x1b2   : > { %v1512_v43 = vsel %vm915_vm3, %v908_v38, %v907_v37  ;;  %v515_v37 = vpop.f32.mrf.mxu3 }
 0x1b3   : > { %v822_v1 = vsel %vm572_vm1, %v744_v0, 0.0  ;;  %v846_v6 = vsel %vm572_vm1, %v752_v5, 0.0  ;;  %v628_v38 = vrot.slane %v515_v37, 1  ;;  %v629_v47 = vrot.slane %v515_v37, 2 }
 0x1b4   : > { %805 = vadd.xlane.f32.xlu2 %v804_v44  ;;  %v631_v55 = vrot.slane %v515_v37, 4 }
 0x1b5   : > { %v666_v42 = vperm.slane %v628_v38, 0  ;;  %v667_v50 = vperm.slane %v629_v47, 0  ;;  %v909_v47 = vperm.slane %v1531_v11, %v1467_v34 }
 0x1b6   : > { %820 = vadd.xlane.f32.xlu0 %v819_v52  ;;  %v1225_v52 = vpack.i.bf16 %v1351_v15, %v1346_v12  ;;  %v669_v57 = vperm.slane %v631_v55, 0  ;;  %v633_v15 = vrot.slane %v515_v37, 6 }
 0x1b7   : > { %v1528_v7 = vpop.xlane.xlu2 %838  ;;  %v730_v44 = vmul.f32 %v666_v42, %v1394_v39  ;;  %v731_v53 = vmul.f32 %v667_v50, %v1383_v29 }
 0x1b8   : > { %v733_v39 = vmul.f32 %v669_v57, %v1378_v28  ;;  %v671_v61 = vperm.slane %v633_v15, 0  ;;  %v665_v28 = vperm.slane %v515_v37, 0 }
 0x1b9   : > { %817 = vadd.xlane.f32.xlu1 %v816_v56  ;;  %v780_v49 = vsel %vm572_vm1, %v730_v44, 0.0  ;;  %v783_v56 = vsel %vm572_vm1, %v731_v53, 0.0 }
 0x1ba   : > { %v789_v59 = vsel %vm572_vm1, %v733_v39, 0.0  ;;  %v735_v0 = vmul.f32 %v671_v61, %v1438_v62  ;;  %v729_v4 = vmul.f32 %v665_v28, %v1372_v23 }
 0x1bc   : > { %814 = vadd.xlane.f32.xlu2 %v813_v58  ;;  %v632_v58 = vrot.slane %v515_v37, 5  ;;  %v777_v5 = vsel %vm572_vm1, %v729_v4, 0.0 }
 0x1be   : > { %v670_v60 = vperm.slane %v632_v58, 0  ;;  %v910_v58 = vperm.slane %v1538_v21, %v1467_v34 }
 0x1c0   : > { %v734_v12 = vmul.f32 %v670_v60, %v1412_v48 }
 0x1c1   : > { %841 = vadd.xlane.f32.xlu1 %v840_v3  ;;  %v795_v3 = vsel %vm572_vm1, %v735_v0, 0.0 }
 0x1c2   : > { %v792_v29 = vsel %vm572_vm1, %v734_v12, 0.0 }
 0x1c4   : > { %823 = vadd.xlane.f32.xlu2 %v822_v1  ;;  %v630_v1 = vrot.slane %v515_v37, 3 }
 0x1c6   : > { %v668_v48 = vperm.slane %v630_v1, 0 }
 0x1c9   : > { %847 = vadd.xlane.f32.xlu1 %v846_v6 }
 0x202   : > { %v575_v8 = vpop.xlane.xlu2 %574 }
 0x203   : > { %v585_v9 = vsub.f32 %v1463_v30, %v575_v8 }
 0x205   : > { %v589_v10 = vmul.f32 1.442695, %v585_v9  ;;  %v732_v9 = vmul.f32 %v668_v48, %v1424_v54 }
 0x207   : > { %1232 = vpow2.f32 %v589_v10 }
 0x20d   : > { %v1533_v13 = vpop.eup %1232 }
 0x20e   : > { %v597_v14 = vsel %vm572_vm1, %v1533_v13, 0.0 }
 0x20f   : > { %598 = vadd.xlane.f32.xlu2 %v597_v14 }
 0x212   : > { %v581_v16 = vpop.xlane.xlu2 %580 }
 0x213   : > { %v587_v19 = vsub.f32 %v1475_v46, %v581_v16  ;;  %v687_v46 = vperm.slane %v647_v26, 0 }
 0x214   : > { %v584_v22 = vpop.xlane.xlu0 %583 }
 0x215   : > { %v593_v24 = vmul.f32 1.442695, %v587_v19  ;;  %v588_v25 = vsub.f32 %v1480_v51, %v584_v22  ;;  %v751_v63 = vmul.f32 %v687_v46, %v1438_v62  ;;  %v786_v62 = vsel %vm572_vm1, %v732_v9, 0.0  ;;  %v1065_v9 = vld [vmem:[%s1670_s4 + $0x18] sm:$0xff] }
 0x217   : > { %1234 = vpow2.f32 %v593_v24  ;;  %v595_v30 = vmul.f32 1.442695, %v588_v25  ;;  %v843_v40 = vsel %vm572_vm1, %v751_v63, 0.0 }
 0x219   : > { %1236 = vpow2.f32 %v595_v30 }
 0x21c   : > { %v578_v27 = vpop.xlane.xlu1 %577 }
 0x21d   : > { %v1542_v31 = vpop.eup %1234  ;;  %v586_v32 = vsub.f32 %v1491_v2, %v578_v27 }
 0x21e   : > { %v603_v33 = vsel %vm572_vm1, %v1542_v31, 0.0 }
 0x21f   : > { %v1547_v35 = vpop.eup %1236  ;;  %v591_v36 = vmul.f32 1.442695, %v586_v32  ;;  %604 = vadd.xlane.f32.xlu2 %v603_v33  ;;  %v803_v14 = vpop.xlane.xlu2 %802 }
 0x220   : > { %v606_v51 = vsel %vm572_vm1, %v1547_v35, 0.0  ;;  %v899_v32 = vperm.slane %v803_v14, %v1467_v34 }
 0x221   : > { %1238 = vpow2.f32 %v591_v36  ;;  %607 = vadd.xlane.f32.xlu0 %v606_v51  ;;  %v812_v25 = vpop.xlane.xlu0 %811 }
 0x224   : > { %v809_v16 = vpop.xlane.xlu1 %808 }
 0x225   : > { %v901_v36 = vperm.slane %v809_v16, %v1467_v34 }
 0x227   : > { %v1553_v2 = vpop.eup %1238  ;;  %844 = vadd.xlane.f32.xlu2 %v843_v40  ;;  %v806_v23 = vpop.xlane.xlu2 %805 }
 0x228   : > { %v600_v41 = vsel %vm572_vm1, %v1553_v2, 0.0  ;;  %v900_v54 = vperm.slane %v806_v23, %v1467_v34 }
 0x229   : > { %601 = vadd.xlane.f32.xlu1 %v600_v41  ;;  %v821_v26 = vpop.xlane.xlu0 %820 }
 0x22a   : > { %v936_v33 = vsel %vm915_vm3, %v900_v54, %v899_v32  ;;  %v905_v57 = vperm.slane %v821_v26, %v1467_v34 }
 0x22c   : > { %v818_v22 = vpop.xlane.xlu1 %817 }
 0x22f   : > { %v815_v19 = vpop.xlane.xlu2 %814 }
 0x230   : > { %v903_v51 = vperm.slane %v815_v19, %v1467_v34 }
 0x231   : > { %781 = vadd.xlane.f32.xlu1 %v780_v49  ;;  %v904_v49 = vperm.slane %v818_v22, %v1467_v34 }
 0x235   : > { %1226 = vrot.lane.b32.xlu0 %v1225_v52, %s1257_s9  ;;  %v944_v52 = vsel %vm917_vm4, %v909_v47, %v1512_v43 }
 0x236   : > { %v945_v15 = vsel %vm919_vm5, %v910_v58, %v944_v52 }
 0x237   : > { %v824_v24 = vpop.xlane.xlu2 %823 }
 0x238   : > { %v906_v55 = vperm.slane %v824_v24, %v1467_v34 }
 0x239   : > { %784 = vadd.xlane.f32.xlu1 %v783_v56  ;;  %v911_v56 = vperm.slane %v1528_v7, %v1467_v34 }
 0x23f   : > { %1036 = vrot.lane.b32.xlu2 %v1354_v17, %s1257_s9  ;;  %v634_v17 = vrot.slane %v515_v37, 7  ;;  %v902_v37 = vperm.slane %v812_v25, %v1467_v34 }
 0x241   : > { %790 = vadd.xlane.f32.xlu1 %v789_v59  ;;  %v672_v6 = vperm.slane %v634_v17, 0 }
 0x243   : > { %v736_v8 = vmul.f32 %v672_v6, %v1405_v45  ;;  %v842_v45 = vpop.xlane.xlu1 %841 }
 0x244   : > { %v912_v59 = vperm.slane %v842_v45, %v1467_v34 }
 0x245   : > { %v798_v10 = vsel %vm572_vm1, %v736_v8, 0.0 }
 0x249   : > { %793 = vadd.xlane.f32.xlu1 %v792_v29 }
 0x24b   : > { %v848_v46 = vpop.xlane.xlu1 %847 }
 0x24c   : > { %v914_v17 = vperm.slane %v848_v46, %v1467_v34 }
 0x251   : > { %796 = vadd.xlane.f32.xlu1 %v795_v3 }
 0x25f   : > { %778 = vadd.xlane.f32.xlu0 %v777_v5 }
 0x267   : > { %799 = vadd.xlane.f32.xlu0 %v798_v10  ;;  %v1064_v10 = vld [vmem:[%s1670_s4 + $0x10] sm:$0xff] }
 0x268   : > { %787 = vadd.xlane.f32.xlu2 %v786_v62 }
 0x26a   : > { %984 = vrot.lane.b32.xlu1 %v1359_v18, %s1257_s9  ;;  %v937_v18 = vsel %vm917_vm4, %v901_v36, %v936_v33 }
 0x26b   : > { %v938_v38 = vsel %vm919_vm5, %v902_v37, %v937_v18 }
 0x26c   : > { %v939_v41 = vsel %vm921_vm6, %v903_v51, %v938_v38 }
 0x26d   : > { %v940_v53 = vsel %vm923_vm7, %v904_v49, %v939_v41  ;;  %v1231_v49 = vld [vmem:[%s1671_s5] ss:$0 sm:$0xff] }
 0x26e   : > { %v941_v43 = vsel %vm925_vm8, %v905_v57, %v940_v53 }
 0x26f   : > { %v942_v7 = vsel %vm927_vm9, %v906_v55, %v941_v43 }
 0x282   : > { %v599_v30 = vpop.xlane.xlu2 %598 }
 0x283   : > { %1240 = vrcp.f32 %v599_v30 }
 0x289   : > { %v1241_v40 = vpop.eup %1240 }
 0x28a   : > { %v613_v39 = vmul.f32 %v1241_v40, %v1533_v13  ;;  %v946_v13 = vsel %vm921_vm6, %v911_v56, %v945_v15 }
 0x28b   : > { %v947_v21 = vsel %vm923_vm7, %v912_v59, %v946_v13 }
 0x292   : > { %v605_v27 = vpop.xlane.xlu2 %604 }
 0x293   : > { %1242 = vrcp.f32 %v605_v27 }
 0x294   : > { %v608_v63 = vpop.xlane.xlu0 %607 }
 0x295   : > { %1244 = vrcp.f32 %v608_v63 }
 0x299   : > { %v1243_v44 = vpop.eup %1242 }
 0x29a   : > { %v845_v42 = vpop.xlane.xlu2 %844  ;;  %v615_v11 = vmul.f32 %v1243_v44, %v1542_v31  ;;  %v954_v31 = vadd.f32 %v1500_v20, %v613_v39 }
 0x29b   : > { %v913_v60 = vperm.slane %v845_v42, %v1467_v34  ;;  %v1245_v3 = vpop.eup %1244  ;;  %v1062_v42 = vld [vmem:[%s1670_s4] sm:$0xff] }
 0x29c   : > { %v602_v50 = vpop.xlane.xlu1 %601  ;;  %v956_v0 = vadd.f32 %v942_v7, %v615_v11  ;;  %v616_v5 = vmul.f32 %v1245_v3, %v1547_v35  ;;  %v1063_v35 = vld [vmem:[%s1670_s4 + $0x8] sm:$0xff] }
 0x29d   : > { %v948_v28 = vsel %vm925_vm8, %v913_v60, %v947_v21  ;;  %1246 = vrcp.f32 %v602_v50 }
 0x29e   : > { %v949_v20 = vsel %vm927_vm9, %v914_v17, %v948_v28 }
 0x29f   : > { %v957_v6 = vadd.f32 %v949_v20, %v616_v5 }
 0x2a2   : > { %v1037_v4 = vpop.permute.xlu2 %1036 }
 0x2a3   : > { %v1247_v32 = vpop.eup %1246 }
 0x2a4   : > { %v782_v1 = vpop.xlane.xlu1 %781  ;;  %v614_v63 = vmul.f32 %v1247_v32, %v1553_v2 }
 0x2a5   : > { %v892_v19 = vperm.slane %v782_v1, %v1467_v34 }
 0x2a7   : > { %v1227_v12 = vpop.permute.xlu0 %1226 }
 0x2a8   : > { %v1229_v29 = vunpack.i.h.bf16 %v1227_v12  ;;  %v1228_v61 = vunpack.i.l.bf16 %v1227_v12 }
 0x2aa   : > { %979 = vmatpush.msrb.mxu3 %v1228_v61  ;;  %1031 = vmatpush.msra.mxu2 %v1229_v29 }
 0x2ab   : > { %1199 = vmatmul.msk.f32.vlgmr.msrb.gmra.mxu3 %vm572_vm1, %v954_v31  ;;  %1201 = vmatmul.msk.f32.vlgmr.msra.gmra.mxu2 %vm572_vm1, %v956_v0 }
 0x2ac   : > { %1057 = vmatpush.msra.mxu3 %v1037_v4  ;;  %v785_v48 = vpop.xlane.xlu1 %784  ;;  %1211 = vmatpush.msrb.mxu2 %v1065_v9 }
 0x2ad   : > { %v893_v24 = vperm.slane %v785_v48, %v1467_v34 }
 0x2ae   : > { %1212 = vmatpush.msrb.mxu2 %v1064_v10 }
 0x2b0   : > { %1213 = vmatpush.msrb.mxu2 %v1063_v35 }
 0x2b2   : > { %1214 = vmatpush.msrb.mxu2 %v1062_v42 }
 0x2b3   : > { %1202 = vmatmul.msk.f32.vlgmr.msra.gmra.mxu3 %vm572_vm1, %v957_v6 }
 0x2b4   : > { %v791_v8 = vpop.xlane.xlu1 %790 }
 0x2b5   : > { %v895_v54 = vperm.slane %v791_v8, %v1467_v34 }
 0x2bc   : > { %v794_v62 = vpop.xlane.xlu1 %793 }
 0x2bd   : > { %v896_v33 = vperm.slane %v794_v62, %v1467_v34 }
 0x2c4   : > { %v797_v23 = vpop.xlane.xlu1 %796 }
 0x2c5   : > { %v897_v36 = vperm.slane %v797_v23, %v1467_v34 }
 0x2d2   : > { %v779_v14 = vpop.xlane.xlu0 %778 }
 0x2d3   : > { %v891_v16 = vperm.slane %v779_v14, %v1467_v34 }
 0x2d5   : > { %v929_v22 = vsel %vm915_vm3, %v892_v19, %v891_v16 }
 0x2d6   : > { %v930_v27 = vsel %vm917_vm4, %v893_v24, %v929_v22 }
 0x2da   : > { %v800_v26 = vpop.xlane.xlu0 %799 }
 0x2db   : > { %v788_v25 = vpop.xlane.xlu2 %787  ;;  %v898_v51 = vperm.slane %v800_v26, %v1467_v34 }
 0x2dc   : > { %v894_v30 = vperm.slane %v788_v25, %v1467_v34  ;;  %v985_v45 = vpop.permute.xlu1 %984 }
 0x2dd   : > { %1005 = vmatpush.msra.mxu1 %v985_v45 }
 0x2de   : > { %v931_v46 = vsel %vm919_vm5, %v894_v30, %v930_v27 }
 0x2df   : > { %1094 = vmatpush.msrb.mxu1 %v1065_v9  ;;  %v932_v18 = vsel %vm921_vm6, %v895_v54, %v931_v46 }
 0x2e0   : > { %v933_v37 = vsel %vm923_vm7, %v896_v33, %v932_v18 }
 0x2e1   : > { %1095 = vmatpush.msrb.mxu1 %v1064_v10  ;;  %v934_v38 = vsel %vm925_vm8, %v897_v36, %v933_v37 }
 0x2e2   : > { %v935_v40 = vsel %vm927_vm9, %v898_v51, %v934_v38 }
 0x2e3   : > { %1096 = vmatpush.msrb.mxu1 %v1063_v35  ;;  %v955_v41 = vadd.f32 %v935_v40, %v614_v63 }
 0x2e5   : > { %1200 = vmatmul.msk.f32.vlgmr.msra.gmra.mxu1 %vm572_vm1, %v955_v41 }
 0x2e6   : > { %1097 = vmatpush.msrb.mxu1 %v1062_v42 }
 0x32e   : > { %v981_v34 = vpop.f32.mrf.mxu3  ;;  %v1033_v44 = vpop.f32.mrf.mxu2 }
 0x32f   : > { %1203 = vmatmul.msk.f32.vlgmr.msrb.gmra.mxu1 %vm318_vm0, %v981_v34  ;;  %1205 = vmatmul.msk.f32.vlgmr.msrb.gmra.mxu2 %vm318_vm0, %v1033_v44 }
 0x336   : > { %v1059_v2 = vpop.f32.mrf.mxu3 }
 0x337   : > { %1206 = vmatmul.msk.f32.gmra.mxu2 %vm318_vm0, %v1059_v2 }
 0x362   : > { %v1007_v47 = vpop.f32.mrf.mxu1 }
 0x363   : > { %1204 = vmatmul.msk.f32.gmra.mxu1 %vm318_vm0, %v1007_v47 }
 0x3ac   : > { %v1099_v50 = vpop.f32.mrf.mxu1 }
 0x3ad   : > { %v1100_v52 = vadd.f32 %v1231_v49, %v1099_v50 }
 0x3af   : > { %1111 = vst.msk [vmem:[%s305_s23] sm:$0xff] %vm318_vm0, %v1100_v52 }
 0x3b2   : > { %v1105_v53 = vpop.f32.mrf.mxu2 }
 0x3b3   : > { %v1106_v55 = vadd.f32 %v1231_v49, %v1105_v53 }
 0x3b5   : > { %1113 = vst.msk [vmem:[%s305_s23 + $0x10] sm:$0xff] %vm318_vm0, %v1106_v55 }
 0x3ba   : > { %v1108_v56 = vpop.f32.mrf.mxu2 }
 0x3bb   : > { %v1109_v57 = vadd.f32 %v1231_v49, %v1108_v56 }
 0x3bd   : > { %1114 = vst.msk [vmem:[%s305_s23 + $0x18] sm:$0xff] %vm318_vm0, %v1109_v57 }
 0x3e0   : > { %v1102_v39 = vpop.f32.mrf.mxu1 }
 0x3e1   : > { %v1103_v11 = vadd.f32 %v1231_v49, %v1102_v39 }
 0x3e3   : > { %1112 = vst.msk [vmem:[%s305_s23 + $0x8] sm:$0xff] %vm318_vm0, %v1103_v11 }
 0x3e4 PF: > { %s18_s27 = sadd.s32 1, %s1254_s27  }
 0x3e5   : > { %p15_p4 = scmp.ge.s32.totalorder %s18_s27, 4  }
 0x3e7   :  { %17 = sbr.rel (!%p15_p4) target bundleno = 1 (0x1), region = 82 }

</bundles_post_ra>
